<compile_context>
chip_gen: v5e
topology: v5e:2x2
jax: 0.10.0
libtpu: 0.0.40
codegen_flags: <defaults>
</compile_context>

<pallas_src>
import functools

import jax
import jax.numpy as jnp
import numpy as np
from jax import lax
from jax.experimental import pallas as pl
from jax.experimental.pallas import tpu as pltpu

_LANE = 128


def _round_up(x, m):
    return ((x + m - 1) // m) * m


def _transition_kernel(z_ref, a_ref, w1z_ref, w1a_ref, w2_ref, w3_ref,
                       bias_ref, out_ref, *, compute_dtype):
    """One batch-tile of the Transition MLP.

    z_ref   : [tb, obs_dim]       a_ref  : [tb, action_dim]
    w1z_ref : [obs_dim, h0]       w1a_ref: [action_dim, h0]
    w2_ref  : [h0, h1]            w3_ref : [h1, out_cols]
    bias_ref: [5, W]  rows = (b1, b2, gamma, beta, b3), zero-padded to W lanes
    out_ref : [tb, out_cols]
    """
    h0 = w2_ref.shape[0]
    h1 = w2_ref.shape[1]
    out_cols = w3_ref.shape[1]

    b1 = bias_ref[0:1, :h0]
    b2 = bias_ref[1:2, :h1]
    gamma = bias_ref[2:3, :h1]
    beta = bias_ref[3:4, :h1]
    b3 = bias_ref[4:5, :out_cols]

    z = z_ref[...].astype(compute_dtype)
    a = a_ref[...].astype(compute_dtype)

    # Layer 1: split-weight dot (no HBM [z|a] concat) + bias + ReLU.
    h = (jnp.dot(z, w1z_ref[...], preferred_element_type=jnp.float32)
         + jnp.dot(a, w1a_ref[...], preferred_element_type=jnp.float32)
         + b1)
    h = jnp.maximum(h, 0.0)

    # Layer 2.
    h = jnp.dot(h.astype(compute_dtype), w2_ref[...],
                preferred_element_type=jnp.float32) + b2

    # LayerNorm over the feature axis (eps=1e-5 as in torch), two-pass form.
    inv_n = jnp.float32(1.0 / h1)
    mean = jnp.sum(h, axis=-1, keepdims=True) * inv_n
    c = h - mean
    var = jnp.sum(c * c, axis=-1, keepdims=True) * inv_n
    h = c * lax.rsqrt(var + 1e-5)
    h = h * gamma + beta

    # ReLU.
    h = jnp.maximum(h, 0.0)

    # Layer 3 (output head).
    out = jnp.dot(h.astype(compute_dtype), w3_ref[...],
                  preferred_element_type=jnp.float32) + b3
    out_ref[...] = out.astype(out_ref.dtype)


@functools.partial(jax.jit,
                   static_argnames=("batch_tile", "use_bf16", "pad_output"))
def transition_forward(z, actions, params, *, batch_tile=1024,
                       use_bf16=False, pad_output=False):
    """JAX wrapper: flatten, pad to tile-friendly shapes, run the fused kernel."""
    B = z.shape[0]
    z_flat = z.reshape(B, -1)                 # nn.Flatten(start_dim=1)
    a_flat = actions.reshape(B, -1)

    w1, b1, w2, b2, g, beta, w3, b3 = params
    obs_dim = z_flat.shape[1]
    action_dim = a_flat.shape[1]
    h0 = w1.shape[1]
    h1 = w2.shape[1]
    out_dim = w3.shape[1]

    # Split first-layer weights -> layer 1 is dot(z,w1z)+dot(a,w1a)+b1.
    w1z = w1[:obs_dim, :]
    w1a = w1[obs_dim:, :]

    # Output head columns: unpadded by default (last dim == full array dim is
    # a legal block shape).  pad_output=True restores the lane-dense slab.
    if pad_output:
        out_cols = _round_up(out_dim, _LANE)
        if out_cols != out_dim:
            w3 = jnp.pad(w3, ((0, 0), (0, out_cols - out_dim)))
            b3 = jnp.pad(b3, ((0, 0), (0, out_cols - out_dim)))
    else:
        out_cols = out_dim

    # Pack the five small row vectors into one (5, W) slab -> one DMA stream.
    W = _round_up(max(h0, h1, out_cols), _LANE)

    def _row(v, n):
        return jnp.pad(v.reshape(1, n).astype(jnp.float32),
                       ((0, 0), (0, W - n)))

    bias_pack = jnp.concatenate(
        [_row(b1, h0), _row(b2, h1), _row(g, h1),
         _row(beta, h1), _row(b3, out_cols)], axis=0)

    # Optional bf16 MXU operands (f32 accumulation stays).
    compute_dtype = jnp.bfloat16 if use_bf16 else jnp.float32
    w1z = w1z.astype(compute_dtype)
    w1a = w1a.astype(compute_dtype)
    w2c = w2.astype(compute_dtype)
    w3c = w3.astype(compute_dtype)

    # Batch tiling: big tiles to amortize per-step overhead; any B handled by
    # zero-padding rows (padded rows are finite through LayerNorm thanks to
    # eps and are sliced away below).
    batch_tile = max(8, _round_up(batch_tile, 8))
    if B <= batch_tile:
        tb = _round_up(B, 8)
        Bp = tb
    else:
        tb = batch_tile
        Bp = _round_up(B, tb)
    if Bp != B:
        z_flat = jnp.pad(z_flat, ((0, Bp - B), (0, 0)))
        a_flat = jnp.pad(a_flat, ((0, Bp - B), (0, 0)))

    grid = (Bp // tb,)

    full = lambda r, c: pl.BlockSpec((r, c), lambda i: (0, 0))
    tiled = lambda c: pl.BlockSpec((tb, c), lambda i: (i, 0))

    flops = 2 * Bp * (obs_dim * h0 + action_dim * h0 + h0 * h1 + h1 * out_cols)
    bytes_accessed = 4 * (
        Bp * (obs_dim + action_dim + out_cols)
        + (obs_dim + action_dim) * h0 + h0 * h1 + h1 * out_cols + 5 * W)
    cost = pl.CostEstimate(flops=flops, transcendentals=Bp,
                           bytes_accessed=bytes_accessed)

    kernel = functools.partial(_transition_kernel, compute_dtype=compute_dtype)

    out = pl.pallas_call(
        kernel,
        out_shape=jax.ShapeDtypeStruct((Bp, out_cols), z.dtype),
        grid_spec=pltpu.PrefetchScalarGridSpec(
            num_scalar_prefetch=0,
            grid=grid,
            in_specs=[
                tiled(obs_dim),              # z   (tiled over batch)
                tiled(action_dim),           # a   (tiled over batch)
                full(obs_dim, h0),           # w1_z
                full(action_dim, h0),        # w1_a
                full(h0, h1),                # w2
                full(h1, out_cols),          # w3
                full(5, W),                  # packed biases / LN params
            ],
            out_specs=tiled(out_cols),
        ),
        compiler_params=pltpu.CompilerParams(
            dimension_semantics=("parallel",),
            vmem_limit_bytes=32 * 1024 * 1024,
        ),
        cost_estimate=cost,
    )(z_flat, a_flat, w1z, w1a, w2c, w3c, bias_pack)

    return out[:B, :out_dim]


def init_params(key, obs_dim, action_dim, hidden_dim=(128, 128)):
    """Deterministic parameter init (torch-like uniform fan-in init)."""
    in_dim = obs_dim + action_dim
    h0, h1 = hidden_dim
    ks = jax.random.split(key, 6)

    def linear(kw, kb, fan_in, fan_out):
        bound = 1.0 / np.sqrt(fan_in)
        w = jax.random.uniform(kw, (fan_in, fan_out), jnp.float32, -bound, bound)
        b = jax.random.uniform(kb, (1, fan_out), jnp.float32, -bound, bound)
        return w, b

    w1, b1 = linear(ks[0], ks[1], in_dim, h0)
    w2, b2 = linear(ks[2], ks[3], h0, h1)
    w3, b3 = linear(ks[4], ks[5], h1, obs_dim)
    gamma = jnp.ones((1, h1), jnp.float32)   # LayerNorm weight init
    beta = jnp.zeros((1, h1), jnp.float32)   # LayerNorm bias init
    return (w1, b1, w2, b2, gamma, beta, w3, b3)


def reference_forward(z, actions, params):
    """Pure-JAX reference matching the PyTorch module semantics."""
    B = z.shape[0]
    za = jnp.concatenate([z.reshape(B, -1), actions.reshape(B, -1)], axis=1)
    w1, b1, w2, b2, g, beta, w3, b3 = params
    h = jnp.maximum(za @ w1 + b1, 0.0)
    h = h @ w2 + b2
    mean = jnp.mean(h, axis=-1, keepdims=True)
    var = jnp.mean((h - mean) ** 2, axis=-1, keepdims=True)
    h = (h - mean) / jnp.sqrt(var + 1e-5) * g + beta
    h = jnp.maximum(h, 0.0)
    return h @ w3 + b3


if __name__ == "__main__":
    # Small shapes: batch=16, obs_dim=16 (z is [B, 2, 8] before flatten),
    # action_dim=8 (actions are [B, 2, 4] before flatten), hidden=[128, 128].
    B, obs_dim, action_dim = 16, 16, 8
    hidden_dim = (128, 128)

    key = jax.random.PRNGKey(0)
    kz, ka, kp = jax.random.split(key, 3)

    z = jax.random.normal(kz, (B, 2, 8), jnp.float32)        # flattens to obs_dim=16
    actions = jax.random.normal(ka, (B, 2, 4), jnp.float32)  # flattens to action_dim=8
    params = init_params(kp, obs_dim, action_dim, hidden_dim)

    delta_z = transition_forward(z, actions, params)
    delta_z = jax.block_until_ready(delta_z)

    ref = reference_forward(z, actions, params)
    np.testing.assert_allclose(np.asarray(delta_z), np.asarray(ref),
                               rtol=1e-4, atol=1e-4)
    print("KERNEL_OK")
</pallas_src>

<mosaic_0001>
module attributes {stable_mosaic.version = 11 : i64} {
  func.func @_transition_kernel(%arg0: i32, %arg1: memref<16x16xf32, #tpu.memory_space<vmem>>, %arg2: memref<16x8xf32, #tpu.memory_space<vmem>>, %arg3: memref<16x128xf32, #tpu.memory_space<vmem>>, %arg4: memref<8x128xf32, #tpu.memory_space<vmem>>, %arg5: memref<128x128xf32, #tpu.memory_space<vmem>>, %arg6: memref<128x16xf32, #tpu.memory_space<vmem>>, %arg7: memref<5x128xf32, #tpu.memory_space<vmem>>, %arg8: memref<16x16xf32, #tpu.memory_space<vmem>>) attributes {dimension_semantics = [#tpu.dimension_semantics<parallel>], iteration_bounds = array<i64: 1>, scalar_prefetch = 0 : i64, scratch_operands = 0 : i64, tpu.core_type = #tpu.core_type<tc>, window_params = [{transform_indices = @transform_0, window_bounds = array<i64: 16, 16>}, {transform_indices = @transform_1, window_bounds = array<i64: 16, 8>}, {pipeline_mode = #tpu.pipeline_mode<synchronous>, transform_indices = @transform_2, window_bounds = array<i64: 16, 128>}, {pipeline_mode = #tpu.pipeline_mode<synchronous>, transform_indices = @transform_3, window_bounds = array<i64: 8, 128>}, {pipeline_mode = #tpu.pipeline_mode<synchronous>, transform_indices = @transform_4, window_bounds = array<i64: 128, 128>}, {pipeline_mode = #tpu.pipeline_mode<synchronous>, transform_indices = @transform_5, window_bounds = array<i64: 128, 16>}, {pipeline_mode = #tpu.pipeline_mode<synchronous>, transform_indices = @transform_6, window_bounds = array<i64: 5, 128>}, {transform_indices = @transform_7, window_bounds = array<i64: 16, 16>}]} {
    %c0 = arith.constant 0 : index
    %c0_0 = arith.constant 0 : index
    %0 = vector.load %arg7[%c0, %c0_0] : memref<5x128xf32, #tpu.memory_space<vmem>>, vector<1x128xf32>
    %c1 = arith.constant 1 : index
    %c0_1 = arith.constant 0 : index
    %1 = vector.load %arg7[%c1, %c0_1] : memref<5x128xf32, #tpu.memory_space<vmem>>, vector<1x128xf32>
    %c2 = arith.constant 2 : index
    %c0_2 = arith.constant 0 : index
    %2 = vector.load %arg7[%c2, %c0_2] : memref<5x128xf32, #tpu.memory_space<vmem>>, vector<1x128xf32>
    %c3 = arith.constant 3 : index
    %c0_3 = arith.constant 0 : index
    %3 = vector.load %arg7[%c3, %c0_3] : memref<5x128xf32, #tpu.memory_space<vmem>>, vector<1x128xf32>
    %c4 = arith.constant 4 : index
    %c0_4 = arith.constant 0 : index
    %4 = vector.load %arg7[%c4, %c0_4] : memref<5x128xf32, #tpu.memory_space<vmem>>, vector<1x16xf32>
    %c0_5 = arith.constant 0 : index
    %c0_6 = arith.constant 0 : index
    %5 = vector.load %arg1[%c0_5, %c0_6] : memref<16x16xf32, #tpu.memory_space<vmem>>, vector<16x16xf32>
    %c0_7 = arith.constant 0 : index
    %c0_8 = arith.constant 0 : index
    %6 = vector.load %arg2[%c0_7, %c0_8] : memref<16x8xf32, #tpu.memory_space<vmem>>, vector<16x8xf32>
    %c0_9 = arith.constant 0 : index
    %c0_10 = arith.constant 0 : index
    %7 = vector.load %arg3[%c0_9, %c0_10] : memref<16x128xf32, #tpu.memory_space<vmem>>, vector<16x128xf32>
    %cst = arith.constant dense<0.000000e+00> : vector<16x128xf32>
    %8 = tpu.matmul %5, %7, %cst {dimension_numbers = #tpu.dot_dimension_numbers<[1], [0], [0], [1], [0, 0, 1, 1], [], []>} : vector<16x16xf32>, vector<16x128xf32>, vector<16x128xf32> -> vector<16x128xf32>
    %c0_11 = arith.constant 0 : index
    %c0_12 = arith.constant 0 : index
    %9 = vector.load %arg4[%c0_11, %c0_12] : memref<8x128xf32, #tpu.memory_space<vmem>>, vector<8x128xf32>
    %cst_13 = arith.constant dense<0.000000e+00> : vector<16x128xf32>
    %10 = tpu.matmul %6, %9, %cst_13 {dimension_numbers = #tpu.dot_dimension_numbers<[1], [0], [0], [1], [0, 0, 1, 1], [], []>} : vector<16x8xf32>, vector<8x128xf32>, vector<16x128xf32> -> vector<16x128xf32>
    %11 = arith.addf %8, %10 : vector<16x128xf32>
    %12 = vector.broadcast %0 : vector<1x128xf32> to vector<16x128xf32>
    %13 = arith.addf %11, %12 : vector<16x128xf32>
    %cst_14 = arith.constant 0.000000e+00 : f32
    %14 = vector.broadcast %cst_14 : f32 to vector<16x128xf32>
    %15 = arith.maximumf %13, %14 : vector<16x128xf32>
    %c0_15 = arith.constant 0 : index
    %c0_16 = arith.constant 0 : index
    %16 = vector.load %arg5[%c0_15, %c0_16] : memref<128x128xf32, #tpu.memory_space<vmem>>, vector<128x128xf32>
    %cst_17 = arith.constant dense<0.000000e+00> : vector<16x128xf32>
    %17 = tpu.matmul %15, %16, %cst_17 {dimension_numbers = #tpu.dot_dimension_numbers<[1], [0], [0], [1], [0, 0, 1, 1], [], []>} : vector<16x128xf32>, vector<128x128xf32>, vector<16x128xf32> -> vector<16x128xf32>
    %18 = vector.broadcast %1 : vector<1x128xf32> to vector<16x128xf32>
    %19 = arith.addf %17, %18 : vector<16x128xf32>
    %cst_18 = arith.constant dense<0.000000e+00> : vector<16xf32>
    %20 = vector.multi_reduction <add>, %19, %cst_18 [1] : vector<16x128xf32> to vector<16xf32>
    %21 = vector.shape_cast %20 : vector<16xf32> to vector<16x1xf32>
    %cst_19 = arith.constant 7.812500e-03 : f32
    %22 = vector.broadcast %cst_19 : f32 to vector<16x1xf32>
    %23 = arith.mulf %21, %22 : vector<16x1xf32>
    %24 = vector.broadcast %23 : vector<16x1xf32> to vector<16x128xf32>
    %25 = arith.subf %19, %24 : vector<16x128xf32>
    %26 = arith.mulf %25, %25 : vector<16x128xf32>
    %cst_20 = arith.constant dense<0.000000e+00> : vector<16xf32>
    %27 = vector.multi_reduction <add>, %26, %cst_20 [1] : vector<16x128xf32> to vector<16xf32>
    %28 = vector.shape_cast %27 : vector<16xf32> to vector<16x1xf32>
    %cst_21 = arith.constant 7.812500e-03 : f32
    %29 = vector.broadcast %cst_21 : f32 to vector<16x1xf32>
    %30 = arith.mulf %28, %29 : vector<16x1xf32>
    %cst_22 = arith.constant 9.99999974E-6 : f32
    %31 = vector.broadcast %cst_22 : f32 to vector<16x1xf32>
    %32 = arith.addf %30, %31 : vector<16x1xf32>
    %33 = math.rsqrt %32 : vector<16x1xf32>
    %34 = vector.broadcast %33 : vector<16x1xf32> to vector<16x128xf32>
    %35 = arith.mulf %25, %34 : vector<16x128xf32>
    %36 = vector.broadcast %2 : vector<1x128xf32> to vector<16x128xf32>
    %37 = arith.mulf %35, %36 : vector<16x128xf32>
    %38 = vector.broadcast %3 : vector<1x128xf32> to vector<16x128xf32>
    %39 = arith.addf %37, %38 : vector<16x128xf32>
    %cst_23 = arith.constant 0.000000e+00 : f32
    %40 = vector.broadcast %cst_23 : f32 to vector<16x128xf32>
    %41 = arith.maximumf %39, %40 : vector<16x128xf32>
    %c0_24 = arith.constant 0 : index
    %c0_25 = arith.constant 0 : index
    %42 = vector.load %arg6[%c0_24, %c0_25] : memref<128x16xf32, #tpu.memory_space<vmem>>, vector<128x16xf32>
    %cst_26 = arith.constant dense<0.000000e+00> : vector<16x16xf32>
    %43 = tpu.matmul %41, %42, %cst_26 {dimension_numbers = #tpu.dot_dimension_numbers<[1], [0], [0], [1], [0, 0, 1, 1], [], []>} : vector<16x128xf32>, vector<128x16xf32>, vector<16x16xf32> -> vector<16x16xf32>
    %44 = vector.broadcast %4 : vector<1x16xf32> to vector<16x16xf32>
    %45 = arith.addf %43, %44 : vector<16x16xf32>
    %c0_27 = arith.constant 0 : index
    %c0_28 = arith.constant 0 : index
    %46 = vector.load %arg8[%c0_27, %c0_28] : memref<16x16xf32, #tpu.memory_space<vmem>>, vector<16x16xf32>
    tpu.vector_store %arg8[%c0_27, %c0_28], %45 {strides = array<i32>} : memref<16x16xf32, #tpu.memory_space<vmem>>, vector<16x16xf32>,
    return
  }
  func.func @transform_0(%arg0: i32) -> (i32, i32) {
    %c0_i32 = arith.constant 0 : i32
    %c0_i32_0 = arith.constant 0 : i32
    return %arg0, %c0_i32 : i32, i32
  }
  func.func @transform_1(%arg0: i32) -> (i32, i32) {
    %c0_i32 = arith.constant 0 : i32
    %c0_i32_0 = arith.constant 0 : i32
    return %arg0, %c0_i32 : i32, i32
  }
  func.func @transform_2(%arg0: i32) -> (i32, i32) {
    %c0_i32 = arith.constant 0 : i32
    %c0_i32_0 = arith.constant 0 : i32
    %c0_i32_1 = arith.constant 0 : i32
    return %c0_i32, %c0_i32_0 : i32, i32
  }
  func.func @transform_3(%arg0: i32) -> (i32, i32) {
    %c0_i32 = arith.constant 0 : i32
    %c0_i32_0 = arith.constant 0 : i32
    %c0_i32_1 = arith.constant 0 : i32
    return %c0_i32, %c0_i32_0 : i32, i32
  }
  func.func @transform_4(%arg0: i32) -> (i32, i32) {
    %c0_i32 = arith.constant 0 : i32
    %c0_i32_0 = arith.constant 0 : i32
    %c0_i32_1 = arith.constant 0 : i32
    return %c0_i32, %c0_i32_0 : i32, i32
  }
  func.func @transform_5(%arg0: i32) -> (i32, i32) {
    %c0_i32 = arith.constant 0 : i32
    %c0_i32_0 = arith.constant 0 : i32
    %c0_i32_1 = arith.constant 0 : i32
    return %c0_i32, %c0_i32_0 : i32, i32
  }
  func.func @transform_6(%arg0: i32) -> (i32, i32) {
    %c0_i32 = arith.constant 0 : i32
    %c0_i32_0 = arith.constant 0 : i32
    %c0_i32_1 = arith.constant 0 : i32
    return %c0_i32, %c0_i32_0 : i32, i32
  }
  func.func @transform_7(%arg0: i32) -> (i32, i32) {
    %c0_i32 = arith.constant 0 : i32
    %c0_i32_0 = arith.constant 0 : i32
    return %arg0, %c0_i32 : i32, i32
  }
}

</mosaic_0001>

<bundles_post_ra>
// kernel: transition_forward.1
= control target key start
LH: loop header
LB: loop body
LE: loop exit
PB: predicated region body
PF: predicated region fallthrough
CT: control target
= control target key end

     0   :  { %vm39_vm0 = vcmask 64512   ;;  %vm69_vm1 = vcmask 130048   ;;  %s520_s0 = inlined_call_operand.vmem [shape: f32[16,16], index: 0, kind: input, shape index: {}]   ;;  %s521_s1 = inlined_call_operand.vmem [shape: f32[16,8], index: 1, kind: input, shape index: {}]   ;;  %s522_s2 = inlined_call_operand.vmem [shape: f32[16,128], index: 2, kind: input, shape index: {}]   ;;  %s523_s3 = inlined_call_operand.vmem [shape: f32[8,128], index: 3, kind: input, shape index: {}]   ;;  %s524_s4 = inlined_call_operand.vmem [shape: f32[128,128], index: 4, kind: input, shape index: {}]   ;;  %s525_s5 = inlined_call_operand.vmem [shape: f32[128,16], index: 5, kind: input, shape index: {}]   ;;  %s526_s6 = inlined_call_operand.vmem [shape: f32[5,128], index: 6, kind: input, shape index: {}]   ;;  %s527_s7 = inlined_call_operand.hbm [shape: f32[16,16], index: 7, kind: output, shape index: {}]  }
   0x1   :  { %v37_v0 = vld [vmem:[%s522_s2 + $0x8] sm:$0xff]  ;;  %v38_v1 = vld [vmem:[%s523_s3] sm:$0xff]  ;;  %v119_v5 = vld [vmem:[%s524_s4 + $0x78] sm:$0xff] }
   0x2   :  { %v36_v2 = vld [vmem:[%s522_s2] sm:$0xff]  ;;  %90 = vmatpush.msra.mxu1 %v37_v0  ;;  %61 = vmatpush.msra.mxu0 %v38_v1  ;;  %v118_v6 = vld [vmem:[%s524_s4 + $0x70] sm:$0xff]  ;;  %v117_v7 = vld [vmem:[%s524_s4 + $0x68] sm:$0xff] }
   0x3   :  { %v34_v3 = vld [vmem:[%s521_s1] sm:$0xff]  ;;  %256 = vmatpush.msra.mxu2 %v119_v5  ;;  %v35_v8 = vld [vmem:[%s521_s1 + $0x8] sm:$0xff]  ;;  %v115_v10 = vld [vmem:[%s524_s4 + $0x58] sm:$0xff] }
   0x4   :  { %v32_v4 = vld [vmem:[%s520_s0] sm:$0xff]  ;;  %252 = vmatmul.msk.f32.vlgmr.msra.gmra.mxu0 %vm39_vm0, %v34_v3  ;;  %91 = vmatpush.msra.mxu1 %v36_v2 }
   0x5   :  { %121 = vmatpush.msrb.mxu0 %v119_v5  ;;  %254 = vmatmul.msk.f32.vlgmr.msra.gmra.mxu1 %vm69_vm1, %v32_v4  ;;  %v116_v9 = vld [vmem:[%s524_s4 + $0x60] sm:$0xff] }
   0x6   :  { %257 = vmatpush.msra.mxu2 %v118_v6 }
   0x7   :  { %122 = vmatpush.msrb.mxu0 %v118_v6 }
   0x8   :  { %258 = vmatpush.msra.mxu2 %v117_v7 }
   0x9   :  { %123 = vmatpush.msrb.mxu0 %v117_v7 }
   0xa   :  { %12 = vsyncpa [#allocation3], 0  ;;  %v33_v11 = vld [vmem:[%s520_s0 + $0x8] sm:$0xff]  ;;  %v114_v12 = vld [vmem:[%s524_s4 + $0x50] sm:$0xff]  ;;  %259 = vmatpush.msra.mxu2 %v116_v9  ;;  %s326_s28 = smov [#allocation2]   ;;  %s240_s9 = sshll.u32 %s527_s7, 4  ;;  %s241_s9 = int_to_ptr.hbm [resolvable:$true] %s240_s9 }
   0xb   :  { %124 = vmatpush.msrb.mxu0 %v116_v9  ;;  %v113_v13 = vld [vmem:[%s524_s4 + $0x48] sm:$0xff]  ;;  %v112_v14 = vld [vmem:[%s524_s4 + $0x40] sm:$0xff]  ;;  %v111_v15 = vld [vmem:[%s524_s4 + $0x38] sm:$0xff]  ;;  %s238_s29 = sshll.u32 %s326_s28, 4  ;;  %s327_s10 = smov 128   ;;  %s239_s29 = int_to_ptr.vmem [resolvable:$true] %s238_s29 }
   0xc   :  { %253 = vmatmul.msk.f32.gmra.mxu0 %vm39_vm0, %v35_v8  ;;  %260 = vmatpush.msra.mxu2 %v115_v10  ;;  %v110_v16 = vld [vmem:[%s524_s4 + $0x30] sm:$0xff]  ;;  %v109_v17 = vld [vmem:[%s524_s4 + $0x28] sm:$0xff]  ;;  %v108_v18 = vld [vmem:[%s524_s4 + $0x20] sm:$0xff]  ;;  %s328_s11 = smov 8  }
   0xd   :  { %125 = vmatpush.msrb.mxu0 %v115_v10  ;;  %255 = vmatmul.msk.f32.gmra.mxu1 %vm69_vm1, %v33_v11  ;;  %v107_v19 = vld [vmem:[%s524_s4 + $0x18] sm:$0xff]  ;;  %v106_v20 = vld [vmem:[%s524_s4 + $0x10] sm:$0xff]  ;;  %v105_v21 = vld [vmem:[%s524_s4 + $0x8] sm:$0xff] }
   0xe   :  { %261 = vmatpush.msra.mxu2 %v114_v12  ;;  %v104_v22 = vld [vmem:[%s524_s4] sm:$0xff]  ;;  %v207_v39 = vld [vmem:[%s525_s5 + $0x78] sm:$0xff]  ;;  %v206_v48 = vld [vmem:[%s525_s5 + $0x70] sm:$0xff] }
   0xf   :  { %126 = vmatpush.msrb.mxu0 %v114_v12  ;;  %v291_v24 = vld [vmem:[%s526_s6] ss:$0 sm:$0xff]  ;;  %v292_v34 = vld [vmem:[%s526_s6 + $0x1] ss:$0 sm:$0xff]  ;;  %272 = vmatpush.msra.mxu3 %v207_v39  ;;  %v205_v49 = vld [vmem:[%s525_s5 + $0x68] sm:$0xff] }
  0x10   :  { %262 = vmatpush.msra.mxu2 %v113_v13  ;;  %209 = vmatpush.msrb.mxu1 %v207_v39  ;;  %v204_v50 = vld [vmem:[%s525_s5 + $0x60] sm:$0xff]  ;;  %v203_v51 = vld [vmem:[%s525_s5 + $0x58] sm:$0xff]  ;;  %v202_v52 = vld [vmem:[%s525_s5 + $0x50] sm:$0xff] }
  0x11   :  { %127 = vmatpush.msrb.mxu0 %v113_v13  ;;  %273 = vmatpush.msra.mxu3 %v206_v48  ;;  %v201_v53 = vld [vmem:[%s525_s5 + $0x48] sm:$0xff]  ;;  %v200_v54 = vld [vmem:[%s525_s5 + $0x40] sm:$0xff]  ;;  %v199_v55 = vld [vmem:[%s525_s5 + $0x38] sm:$0xff] }
  0x12   :  { %263 = vmatpush.msra.mxu2 %v112_v14  ;;  %210 = vmatpush.msrb.mxu1 %v206_v48  ;;  %v198_v56 = vld [vmem:[%s525_s5 + $0x30] sm:$0xff]  ;;  %v197_v57 = vld [vmem:[%s525_s5 + $0x28] sm:$0xff]  ;;  %v196_v58 = vld [vmem:[%s525_s5 + $0x20] sm:$0xff] }
  0x13   :  { %128 = vmatpush.msrb.mxu0 %v112_v14  ;;  %274 = vmatpush.msra.mxu3 %v205_v49  ;;  %v195_v59 = vld [vmem:[%s525_s5 + $0x18] sm:$0xff]  ;;  %v194_v60 = vld [vmem:[%s525_s5 + $0x10] sm:$0xff]  ;;  %v193_v61 = vld [vmem:[%s525_s5 + $0x8] sm:$0xff] }
  0x14   :  { %264 = vmatpush.msra.mxu2 %v111_v15  ;;  %211 = vmatpush.msrb.mxu1 %v205_v49  ;;  %v192_v62 = vld [vmem:[%s525_s5] sm:$0xff] }
  0x15   :  { %129 = vmatpush.msrb.mxu0 %v111_v15  ;;  %275 = vmatpush.msra.mxu3 %v204_v50  ;;  %v293_v13 = vld [vmem:[%s526_s6 + $0x2] ss:$0 sm:$0xff] }
  0x16   :  { %265 = vmatpush.msra.mxu2 %v110_v16  ;;  %212 = vmatpush.msrb.mxu1 %v204_v50 }
  0x17   :  { %130 = vmatpush.msrb.mxu0 %v110_v16  ;;  %276 = vmatpush.msra.mxu3 %v203_v51 }
  0x18   :  { %266 = vmatpush.msra.mxu2 %v109_v17  ;;  %213 = vmatpush.msrb.mxu1 %v203_v51 }
  0x19   :  { %131 = vmatpush.msrb.mxu0 %v109_v17  ;;  %277 = vmatpush.msra.mxu3 %v202_v52  ;;  %v294_v17 = vld [vmem:[%s526_s6 + $0x3] ss:$0 sm:$0xff] }
  0x1a   :  { %267 = vmatpush.msra.mxu2 %v108_v18  ;;  %214 = vmatpush.msrb.mxu1 %v202_v52 }
  0x1b   :  { %132 = vmatpush.msrb.mxu0 %v108_v18  ;;  %278 = vmatpush.msra.mxu3 %v201_v53 }
  0x1c   :  { %268 = vmatpush.msra.mxu2 %v107_v19  ;;  %215 = vmatpush.msrb.mxu1 %v201_v53 }
  0x1d   :  { %133 = vmatpush.msrb.mxu0 %v107_v19  ;;  %279 = vmatpush.msra.mxu3 %v200_v54 }
  0x1e   :  { %269 = vmatpush.msra.mxu2 %v106_v20  ;;  %216 = vmatpush.msrb.mxu1 %v200_v54 }
  0x1f   :  { %134 = vmatpush.msrb.mxu0 %v106_v20  ;;  %280 = vmatpush.msra.mxu3 %v199_v55 }
  0x20   :  { %270 = vmatpush.msra.mxu2 %v105_v21  ;;  %217 = vmatpush.msrb.mxu1 %v199_v55 }
  0x21   :  { %135 = vmatpush.msrb.mxu0 %v105_v21  ;;  %281 = vmatpush.msra.mxu3 %v198_v56 }
  0x22   :  { %271 = vmatpush.msra.mxu2 %v104_v22  ;;  %218 = vmatpush.msrb.mxu1 %v198_v56 }
  0x23   :  { %136 = vmatpush.msrb.mxu0 %v104_v22  ;;  %282 = vmatpush.msra.mxu3 %v197_v57 }
  0x24   :  { %219 = vmatpush.msrb.mxu1 %v197_v57 }
  0x25   :  { %283 = vmatpush.msra.mxu3 %v196_v58 }
  0x26   :  { %220 = vmatpush.msrb.mxu1 %v196_v58 }
  0x27   :  { %284 = vmatpush.msra.mxu3 %v195_v59 }
  0x28   :  { %221 = vmatpush.msrb.mxu1 %v195_v59 }
  0x29   :  { %285 = vmatpush.msra.mxu3 %v194_v60 }
  0x2a   :  { %222 = vmatpush.msrb.mxu1 %v194_v60 }
  0x2b   :  { %286 = vmatpush.msra.mxu3 %v193_v61 }
  0x2c   :  { %223 = vmatpush.msrb.mxu1 %v193_v61 }
  0x2d   :  { %287 = vmatpush.msra.mxu3 %v192_v62 }
  0x2e   :  { %224 = vmatpush.msrb.mxu1 %v192_v62 }
  0x81   :  { %v63_v23 = vpop.f32.mrf.mxu0 }
  0x82   :  { %v93_v25 = vpop.f32.mrf.mxu1 }
  0x83   :  { %v94_v26 = vadd.f32 %v93_v25, %v63_v23 }
  0x85   :  { %v100_v27 = vadd.f32 %v291_v24, %v94_v26 }
  0x87   :  { %v102_v28 = vmax.f32 %v100_v27, 0.0 }
  0x89   :  { %v66_v29 = vpop.f32.mrf.mxu0  ;;  %137 = vmatmul.f32.vlgmr.msrb.gmra.mxu0 %v102_v28 }
  0x8a   :  { %v96_v30 = vpop.f32.mrf.mxu1 }
  0x8b   :  { %v97_v31 = vadd.f32 %v96_v30, %v66_v29  ;;  %v295_v29 = vld [vmem:[%s526_s6 + $0x4] ss:$0 sm:$0xff] }
  0x8d   :  { %v101_v32 = vadd.f32 %v291_v24, %v97_v31 }
  0x8f   :  { %v103_v33 = vmax.f32 %v101_v32, 0.0 }
  0x91   :  { %140 = vmatmul.f32.vlgmr.msra.gmra.mxu2 %v103_v33 }
 0x106   :  { %v138_v37 = vpop.f32.mrf.mxu0 }
 0x107   :  { %v139_v38 = vadd.f32 %v292_v34, %v138_v37 }
 0x114   :  { %v141_v35 = vpop.f32.mrf.mxu2 }
 0x115   :  { %v142_v36 = vadd.f32 %v292_v34, %v141_v35 }
 0x117   :  { %146 = vadd.xlane.f32.xlu0 %v142_v36 }
 0x11f   :  { %144 = vadd.xlane.f32.xlu0 %v139_v38 }
 0x18a   :  { %v147_v40 = vpop.xlane.xlu0 %146 }
 0x18b   :  { %v149_v41 = vmul.f32 0.0078125, %v147_v40 }
 0x18d   :  { %v451_v42 = vsub.f32 %v142_v36, %v149_v41 }
 0x18f   :  { %v153_v43 = vmul.f32 %v451_v42, %v451_v42 }
 0x191   :  { %156 = vadd.xlane.f32.xlu1 %v153_v43 }
 0x192   :  { %v145_v44 = vpop.xlane.xlu0 %144 }
 0x193   :  { %v148_v45 = vmul.f32 0.0078125, %v145_v44 }
 0x195   :  { %v455_v46 = vsub.f32 %v139_v38, %v148_v45 }
 0x197   :  { %v152_v47 = vmul.f32 %v455_v46, %v455_v46 }
 0x199   :  { %154 = vadd.xlane.f32.xlu1 %v152_v47 }
 0x204   :  { %v157_v63 = vpop.xlane.xlu1 %156 }
 0x205   :  { %v159_v0 = vmul.f32 0.0078125, %v157_v63 }
 0x207   :  { %v161_v1 = vadd.f32 1e-05, %v159_v0 }
 0x209   :  { %296 = vrsqrt.f32 %v161_v1  ;;  %vm178_vm3 = vweird.f32 %v161_v1 }
 0x20c   :  { %v155_v2 = vpop.xlane.xlu1 %154 }
 0x20d   :  { %v158_v3 = vmul.f32 0.0078125, %v155_v2 }
 0x20f   :  { %v297_v4 = vpop.eup %296  ;;  %v160_v5 = vadd.f32 1e-05, %v158_v3 }
 0x210   :  { %v173_v6 = vmul.f32 %v297_v4, %v161_v1  ;;  %vm179_vm2 = vweird.f32 %v297_v4 }
 0x211   :  { %298 = vrsqrt.f32 %v160_v5  ;;  %vm180_vm4 = vmor %vm178_vm3, %vm179_vm2  ;;  %vm168_vm6 = vweird.f32 %v160_v5 }
 0x212   :  { %v174_v7 = vmul.f32 %v297_v4, %v173_v6 }
 0x214   :  { %v175_v8 = vmul.f32 0.5, %v174_v7 }
 0x216   :  { %v176_v9 = vsub.f32 1.5, %v175_v8 }
 0x217   :  { %v299_v10 = vpop.eup %298 }
 0x218   :  { %v177_v11 = vmul.f32 %v297_v4, %v176_v9  ;;  %v163_v12 = vmul.f32 %v299_v10, %v160_v5  ;;  %vm169_vm5 = vweird.f32 %v299_v10 }
 0x219   :  { %vm170_vm7 = vmor %vm168_vm6, %vm169_vm5 }
 0x21a   :  { %v164_v14 = vmul.f32 %v299_v10, %v163_v12  ;;  %v181_v15 = vsel %vm180_vm4, %v297_v4, %v177_v11 }
 0x21b   :  { %v183_v16 = vmul.f32 %v181_v15, %v451_v42 }
 0x21c   :  { %v165_v18 = vmul.f32 0.5, %v164_v14 }
 0x21d   :  { %v186_v19 = vmul.f32 %v293_v13, %v183_v16 }
 0x21e   :  { %v166_v20 = vsub.f32 1.5, %v165_v18 }
 0x21f   :  { %v189_v21 = vadd.f32 %v294_v17, %v186_v19 }
 0x220   :  { %v167_v22 = vmul.f32 %v299_v10, %v166_v20 }
 0x221   :  { %v191_v23 = vmax.f32 %v189_v21, 0.0 }
 0x222   :  { %v171_v24 = vsel %vm170_vm7, %v299_v10, %v167_v22 }
 0x223   :  { %228 = vmatmul.f32.vlgmr.msra.gmra.mxu3 %v191_v23  ;;  %v182_v25 = vmul.f32 %v171_v24, %v455_v46 }
 0x225   :  { %v185_v26 = vmul.f32 %v293_v13, %v182_v25 }
 0x227   :  { %v188_v27 = vadd.f32 %v294_v17, %v185_v26 }
 0x229   :  { %v190_v28 = vmax.f32 %v188_v27, 0.0 }
 0x22b   :  { %225 = vmatmul.f32.vlgmr.msrb.gmra.mxu1 %v190_v28 }
 0x2a6   :  { %v229_v30 = vpop.f32.mrf.mxu3 }
 0x2a7   :  { %v230_v31 = vadd.f32 %v295_v29, %v229_v30 }
 0x2a8   :  { %v226_v32 = vpop.f32.mrf.mxu1 }
 0x2a9   :  { %233 = vst.msk [vmem:[#allocation2 + $0x8] sm:$0xff] %vm69_vm1, %v230_v31  ;;  %v227_v33 = vadd.f32 %v295_v29, %v226_v32 }
 0x2ab   :  { %232 = vst.msk [vmem:[#allocation2] sm:$0xff] %vm69_vm1, %v227_v33 }
 0x2ac   :  { %246 = dma.vmem_to_hbm [thread:$0]  %s239_s29, 256, %s241_s9, [#allocation3], %s327_s10, %s327_s10, %s328_s11  }
 0x2ad   :  { %324 = dma.done.wait [#allocation3], 256  }
 0x2ae   :  { %325 = vsyncadd [#allocation3], 4294967040 }
 0x2af   :  { %251 = vsyncpa [#allocation3], 1 }

</bundles_post_ra>
